<compile_context>
chip_gen: v7x
topology: tpu7x:2x2x1
jax: 0.10.0
libtpu: 0.0.40
codegen_flags: <defaults>
</compile_context>

<pallas_src>
import jax
import jax.numpy as jnp
from jax.experimental import pallas as pl
from jax.experimental.pallas import tpu as pltpu


def fused_linear_kernel(slab_ref, b_ref, o_ref):
    # slab_ref: (6, 12) VMEM -- rows 0..4 = packed inputs (5x12), row 5 = weight.
    # b_ref:    (1, 1)  SMEM -- bias scalar.
    # o_ref:    (5, 1)  VMEM -- output column.
    slab = slab_ref[...]                              # single (6, 12) load
    x = slab[0:5, :]                                  # (5, 12) data rows
    w = slab[5:6, :]                                  # (1, 12) weight row
    # One VPU multiply (broadcast over sublanes) + one XLU lane reduction.
    red = jnp.sum(x * w, axis=-1, keepdims=True)      # (5, 1)
    o_ref[...] = red + b_ref[0, 0]


@jax.jit
def model_forward(params, x1, x2, x3, x4, x5, x6):
    # Pack the six inputs in flattened-cat order into (5, 12) and append the
    # weight row -> one (6, 12) slab. This is a 72-element XLA concat/reshape
    # (negligible) and collapses eight pallas operands / DMAs into two.
    flat = jnp.concatenate(
        [x1.reshape(-1), x2.reshape(-1), x3.reshape(-1),
         x4.reshape(-1), x5.reshape(-1), x6.reshape(-1)]
    ).reshape(5, 12)
    slab = jnp.concatenate([flat, params["w"].reshape(1, 12)], axis=0)  # (6, 12)

    return pl.pallas_call(
        fused_linear_kernel,
        out_shape=jax.ShapeDtypeStruct((5, 1), jnp.float32),
        in_specs=[
            pl.BlockSpec(memory_space=pltpu.MemorySpace.VMEM),   # slab (6, 12)
            pl.BlockSpec(memory_space=pltpu.MemorySpace.SMEM),   # bias (1, 1)
        ],
        out_specs=pl.BlockSpec(memory_space=pltpu.MemorySpace.VMEM),
    )(slab, params["b"])


def init_params(key):
    # Mimic torch.nn.Linear(12, 1) default init: U[-1/sqrt(12), 1/sqrt(12)]
    kw, kb = jax.random.split(key)
    bound = 1.0 / jnp.sqrt(12.0)
    w = jax.random.uniform(kw, (1, 12), jnp.float32, minval=-bound, maxval=bound)
    b = jax.random.uniform(kb, (1, 1), jnp.float32, minval=-bound, maxval=bound)
    return {"w": w, "b": b}


if __name__ == "__main__":
    key = jax.random.PRNGKey(0)
    k_params, k1, k2, k3, k4, k5, k6 = jax.random.split(key, 7)
    params = init_params(k_params)

    x1 = jax.random.normal(k1, (12,), jnp.float32)
    x2 = jax.random.normal(k2, (12,), jnp.float32)
    x3 = jax.random.normal(k3, (3, 3), jnp.float32)
    x4 = jax.random.normal(k4, (3, 3), jnp.float32)
    x5 = jax.random.normal(k5, (3, 3), jnp.float32)
    x6 = jax.random.normal(k6, (3, 3), jnp.float32)

    out = model_forward(params, x1, x2, x3, x4, x5, x6)
    out = jax.block_until_ready(out)

    # Reference check against plain JAX (same repaired semantics).
    flat = jnp.concatenate(
        [x1.reshape(1, -1), x2.reshape(1, -1), x3.reshape(1, -1),
         x4.reshape(1, -1), x5.reshape(1, -1), x6.reshape(1, -1)], axis=1
    ).reshape(-1, 12)                          # (5, 12)
    ref = flat @ params["w"].T + params["b"]   # (5, 1)

    assert out.shape == (5, 1)
    assert jnp.allclose(out, ref, atol=1e-5), "mismatch vs reference"

    print("KERNEL_OK")
</pallas_src>

<mosaic_0001>
module attributes {stable_mosaic.version = 11 : i64} {
  func.func @fused_linear_kernel(%arg0: memref<6x12xf32, #tpu.memory_space<vmem>>, %arg1: memref<1x1xf32, #tpu.memory_space<smem>>, %arg2: memref<5x1xf32, #tpu.memory_space<vmem>>) attributes {dimension_semantics = [], scalar_prefetch = 0 : i64, scratch_operands = 0 : i64, tpu.core_type = #tpu.core_type<tc>} {
    %c0 = arith.constant 0 : index
    %c0_0 = arith.constant 0 : index
    %0 = vector.load %arg0[%c0, %c0_0] : memref<6x12xf32, #tpu.memory_space<vmem>>, vector<6x12xf32>
    %1 = vector.extract_strided_slice %0 {offsets = [0, 0], sizes = [5, 12], strides = [1, 1]} : vector<6x12xf32> to vector<5x12xf32>
    %2 = vector.extract_strided_slice %0 {offsets = [5, 0], sizes = [1, 12], strides = [1, 1]} : vector<6x12xf32> to vector<1x12xf32>
    %3 = vector.broadcast %2 : vector<1x12xf32> to vector<5x12xf32>
    %4 = arith.mulf %1, %3 : vector<5x12xf32>
    %cst = arith.constant dense<0.000000e+00> : vector<5xf32>
    %5 = vector.multi_reduction <add>, %4, %cst [1] : vector<5x12xf32> to vector<5xf32>
    %6 = vector.shape_cast %5 : vector<5xf32> to vector<5x1xf32>
    %c0_1 = arith.constant 0 : index
    %c0_2 = arith.constant 0 : index
    %7 = memref.load %arg1[%c0_1, %c0_2] : memref<1x1xf32, #tpu.memory_space<smem>>
    %8 = vector.broadcast %7 : f32 to vector<5x1xf32>
    %9 = arith.addf %6, %8 : vector<5x1xf32>
    %c0_3 = arith.constant 0 : index
    %c0_4 = arith.constant 0 : index
    %10 = vector.load %arg2[%c0_3, %c0_4] : memref<5x1xf32, #tpu.memory_space<vmem>>, vector<5x1xf32>
    tpu.vector_store %arg2[%c0_3, %c0_4], %9 {strides = array<i32>} : memref<5x1xf32, #tpu.memory_space<vmem>>, vector<5x1xf32>,
    return
  }
}

</mosaic_0001>

<bundles_post_ra>
// kernel: model_forward.1
= control target key start
LH: loop header
LB: loop body
LE: loop exit
PB: predicated region body
PF: predicated region fallthrough
CT: control target
= control target key end

     0   :  { %v13_v0 = vlaneseq  ;;  %vm18_vm0 = vcmask 94208   ;;  %vm25_vm1 = vcmask 4096   ;;  %s55_s0 = inlined_call_operand.vmem [shape: f32[6,12], index: 0, kind: input, shape index: {}]   ;;  %s56_s1 = inlined_call_operand.<no memory space> [shape: f32[1,1], index: 1, kind: input, shape index: {}]   ;;  %s57_s2 = inlined_call_operand.vmem [shape: f32[5,1], index: 2, kind: output, shape index: {}]  }
   0x1   :  { %v12_v2 = vld [vmem:[%s55_s0] sm:$0x3f]  ;;  %v23_v7 = vstv %s56_s1 }
   0x2   :  { %v14_v1 = vshrl.u32 %v13_v0, 7 }
   0x4   :  { %v15_v3 = vsub.s32 5, %v14_v1 }
   0x6   :  { %v16_v4 = vrot.slane %v12_v2, %v15_v3 }
   0x8   :  { %v17_v5 = vmul.f32 %v16_v4, %v12_v2 }
   0xa   :  { %v19_v6 = vsel %vm18_vm0, %v17_v5, 0.0 }
   0xb   :  { %20 = vadd.xlane.f32.xlu0 %v19_v6 }
  0x98   :  { %v21_v8 = vpop.xlane.xlu0 %20 }
  0x99   :  { %v24_v9 = vadd.f32 %v23_v7, %v21_v8 }
  0x9b   :  { %26 = vst.msk [vmem:[%s57_s2] sm:$0x1f] %vm25_vm1, %v24_v9 }

</bundles_post_ra>
